<compile_context>
chip_gen: v7x
topology: tpu7x:2x2x1
jax: 0.10.0
libtpu: 0.0.40
codegen_flags: <defaults>
</compile_context>

<pallas_src>
import math

import jax
import jax.numpy as jnp
from jax.experimental import pallas as pl
from jax.experimental.pallas import tpu as pltpu


def _conv1x3_kernel(x_ref, w_ref, b_ref, ml_ref, mr_ref, o_ref):
    # x_ref : (Cin, TM)        one image's channels-first, flattened H*W tile
    # w_ref : (Cout, 3*Cin)    taps packed as [kw=0 | kw=1 | kw=2] along K
    # b_ref : (Cout, 1)
    # ml_ref: (1, TM)          0 where col == 0      (left tap crosses row start)
    # mr_ref: (1, TM)          0 where col == W - 1  (right tap crosses row end)
    # o_ref : (Cout, TM)       lane-dense output block (TM % 128 == 0)
    tm = x_ref.shape[-1]
    x = x_ref[...]

    # Shifted copies along the flattened spatial axis (fused im2col for the
    # (1,3) window).  The cyclic wrap element of each roll always lands on a
    # masked (col==0 / col==W-1) position because TM % W == 0, so masking
    # reproduces the conv's zero padding of width 1 exactly.
    x_left = pltpu.roll(x, shift=1, axis=1) * ml_ref[...]        # value at w-1
    x_right = pltpu.roll(x, shift=tm - 1, axis=1) * mr_ref[...]  # value at w+1

    rhs = jnp.concatenate([x_left, x, x_right], axis=0)          # (3*Cin, TM)
    acc = jnp.dot(w_ref[...], rhs, preferred_element_type=jnp.float32)
    o_ref[...] = (acc + b_ref[...]).astype(o_ref.dtype)


def conv2d_1x3_pallas(x_nchw, weight_oihw, bias, *, tile_m_target=8192):
    """Conv2d, kernel (1,3), stride 1, padding (0,1), via a Pallas matmul.

    x_nchw: (N, Cin, H, W) f32;  weight: (Cout, Cin, 1, 3);  bias: (Cout,)
    returns (N, Cout, H, W) f32
    """
    N, Cin, H, W = x_nchw.shape
    Cout, _, KH, KW = weight_oihw.shape
    assert (KH, KW) == (1, 3)
    HW = H * W

    # Free reshape: NCHW -> (N, Cin, H*W); W stays the minormost axis.
    x = x_nchw.reshape(N, Cin, HW)

    # Tile over the flattened per-image spatial positions.  The tile must be
    # a multiple of W (tiles aligned to image rows -> no cross-tile halo) and
    # of 128 (lane-dense, unmasked stores).
    step = (W * 128) // math.gcd(W, 128)                 # lcm(W, 128)
    hw_ceil = ((HW + step - 1) // step) * step
    tm = max(step, (tile_m_target // step) * step)
    tm = min(tm, hw_ceil)
    assert tm % W == 0 and tm % 128 == 0
    m_pad = ((HW + tm - 1) // tm) * tm
    if m_pad != HW:
        x = jnp.pad(x, ((0, 0), (0, 0), (0, m_pad - HW)))

    # weight (Cout, Cin, 1, KW) -> (Cout, KW*Cin) with K index = kw*Cin + cin,
    # matching the [x_left; x; x_right] sublane stacking in the kernel.
    w_flat = jnp.transpose(weight_oihw[:, :, 0, :], (0, 2, 1)).reshape(Cout, KW * Cin)
    b_col = bias.reshape(Cout, 1)

    # Tile-invariant row-boundary masks (tm % W == 0 -> same for every tile).
    col = jnp.arange(tm, dtype=jnp.int32) % W
    mask_l = (col != 0).astype(jnp.float32).reshape(1, tm)
    mask_r = (col != W - 1).astype(jnp.float32).reshape(1, tm)

    n_tiles = m_pad // tm
    grid = (N, n_tiles)

    out = pl.pallas_call(
        _conv1x3_kernel,
        out_shape=jax.ShapeDtypeStruct((N, Cout, m_pad), jnp.float32),
        grid_spec=pltpu.PrefetchScalarGridSpec(
            num_scalar_prefetch=0,
            grid=grid,
            in_specs=[
                pl.BlockSpec((pl.Squeezed(), Cin, tm), lambda n, i: (n, 0, i)),
                pl.BlockSpec((Cout, KW * Cin), lambda n, i: (0, 0)),
                pl.BlockSpec((Cout, 1), lambda n, i: (0, 0)),
                pl.BlockSpec((1, tm), lambda n, i: (0, 0)),
                pl.BlockSpec((1, tm), lambda n, i: (0, 0)),
            ],
            out_specs=pl.BlockSpec((pl.Squeezed(), Cout, tm),
                                   lambda n, i: (n, 0, i)),
        ),
        compiler_params=pltpu.CompilerParams(
            dimension_semantics=("parallel", "parallel")),
    )(x, w_flat, b_col, mask_l, mask_r)

    if m_pad != HW:
        out = out[:, :, :HW]
    # Free reshape back to NCHW.
    return out.reshape(N, Cout, H, W)


class BPallas:
    """JAX/Pallas equivalent of the PyTorch module B."""

    def __init__(self, key):
        Cout, Cin, KH, KW = 32, 3, 1, 3
        k_w, k_b = jax.random.split(key)
        # deterministic init (~ PyTorch kaiming-uniform bound = 1/sqrt(fan_in))
        bound = 1.0 / (Cin * KH * KW) ** 0.5
        self.weight = jax.random.uniform(
            k_w, (Cout, Cin, KH, KW), jnp.float32, -bound, bound)
        self.bias = jax.random.uniform(k_b, (Cout,), jnp.float32, -bound, bound)

    def __call__(self, x1):
        return conv2d_1x3_pallas(x1, self.weight, self.bias)


if __name__ == "__main__":
    key = jax.random.PRNGKey(0)
    k_x, k_p = jax.random.split(key)

    # small input consistent with the module: N=2, Cin=3, H=16, W=16 (NCHW)
    x1 = jax.random.normal(k_x, (2, 3, 16, 16), jnp.float32)

    mod = BPallas(k_p)
    out = mod(x1)
    out = jax.block_until_ready(out)

    # sanity check against XLA's native conv
    ref = jax.lax.conv_general_dilated(
        x1, mod.weight, window_strides=(1, 1),
        padding=((0, 0), (1, 1)),
        dimension_numbers=("NCHW", "OIHW", "NCHW"),
    ) + mod.bias.reshape(1, -1, 1, 1)

    assert out.shape == (2, 32, 16, 16), out.shape
    assert jnp.allclose(out, ref, atol=1e-4, rtol=1e-4)
    print("KERNEL_OK")
</pallas_src>

<mosaic_0001>
module attributes {stable_mosaic.version = 11 : i64} {
  func.func @_conv1x3_kernel(%arg0: i32, %arg1: i32, %arg2: memref<1x3x256xf32, #tpu.memory_space<vmem>>, %arg3: memref<32x9xf32, #tpu.memory_space<vmem>>, %arg4: memref<32x1xf32, #tpu.memory_space<vmem>>, %arg5: memref<1x256xf32, #tpu.memory_space<vmem>>, %arg6: memref<1x256xf32, #tpu.memory_space<vmem>>, %arg7: memref<1x32x256xf32, #tpu.memory_space<vmem>>) attributes {dimension_semantics = [#tpu.dimension_semantics<parallel>, #tpu.dimension_semantics<parallel>], iteration_bounds = array<i64: 2, 1>, scalar_prefetch = 0 : i64, scratch_operands = 0 : i64, tpu.core_type = #tpu.core_type<tc>, window_params = [{transform_indices = @transform_0, window_bounds = array<i64: 1, 3, 256>}, {pipeline_mode = #tpu.pipeline_mode<synchronous>, transform_indices = @transform_1, window_bounds = array<i64: 32, 9>}, {pipeline_mode = #tpu.pipeline_mode<synchronous>, transform_indices = @transform_2, window_bounds = array<i64: 32, 1>}, {pipeline_mode = #tpu.pipeline_mode<synchronous>, transform_indices = @transform_3, window_bounds = array<i64: 1, 256>}, {pipeline_mode = #tpu.pipeline_mode<synchronous>, transform_indices = @transform_4, window_bounds = array<i64: 1, 256>}, {transform_indices = @transform_5, window_bounds = array<i64: 1, 32, 256>}]} {
    %c0 = arith.constant 0 : index
    %c0_0 = arith.constant 0 : index
    %c0_1 = arith.constant 0 : index
    %0 = vector.load %arg2[%c0, %c0_0, %c0_1] : memref<1x3x256xf32, #tpu.memory_space<vmem>>, vector<1x3x256xf32>
    %1 = vector.shape_cast %0 : vector<1x3x256xf32> to vector<3x256xf32>
    %c1_i32 = arith.constant 1 : i32
    %2 = tpu.dynamic_rotate %1 by %c1_i32 dim 1 : vector<3x256xf32>, i32 -> vector<3x256xf32>
    %c0_2 = arith.constant 0 : index
    %c0_3 = arith.constant 0 : index
    %3 = vector.load %arg5[%c0_2, %c0_3] : memref<1x256xf32, #tpu.memory_space<vmem>>, vector<1x256xf32>
    %4 = vector.broadcast %3 : vector<1x256xf32> to vector<3x256xf32>
    %5 = arith.mulf %2, %4 : vector<3x256xf32>
    %c255_i32 = arith.constant 255 : i32
    %6 = tpu.dynamic_rotate %1 by %c255_i32 dim 1 : vector<3x256xf32>, i32 -> vector<3x256xf32>
    %c0_4 = arith.constant 0 : index
    %c0_5 = arith.constant 0 : index
    %7 = vector.load %arg6[%c0_4, %c0_5] : memref<1x256xf32, #tpu.memory_space<vmem>>, vector<1x256xf32>
    %8 = vector.broadcast %7 : vector<1x256xf32> to vector<3x256xf32>
    %9 = arith.mulf %6, %8 : vector<3x256xf32>
    %10 = tpu.concatenate %5, %1, %9 in 0 : vector<3x256xf32>, vector<3x256xf32>, vector<3x256xf32> -> vector<9x256xf32>
    %c0_6 = arith.constant 0 : index
    %c0_7 = arith.constant 0 : index
    %11 = vector.load %arg3[%c0_6, %c0_7] : memref<32x9xf32, #tpu.memory_space<vmem>>, vector<32x9xf32>
    %cst = arith.constant dense<0.000000e+00> : vector<32x256xf32>
    %12 = tpu.matmul %11, %10, %cst {dimension_numbers = #tpu.dot_dimension_numbers<[1], [0], [0], [1], [0, 0, 1, 1], [], []>} : vector<32x9xf32>, vector<9x256xf32>, vector<32x256xf32> -> vector<32x256xf32>
    %c0_8 = arith.constant 0 : index
    %c0_9 = arith.constant 0 : index
    %13 = vector.load %arg4[%c0_8, %c0_9] : memref<32x1xf32, #tpu.memory_space<vmem>>, vector<32x1xf32>
    %14 = vector.broadcast %13 : vector<32x1xf32> to vector<32x256xf32>
    %15 = arith.addf %12, %14 : vector<32x256xf32>
    %c0_10 = arith.constant 0 : index
    %c0_11 = arith.constant 0 : index
    %c0_12 = arith.constant 0 : index
    %16 = vector.load %arg7[%c0_10, %c0_11, %c0_12] : memref<1x32x256xf32, #tpu.memory_space<vmem>>, vector<1x32x256xf32>
    %17 = vector.shape_cast %16 : vector<1x32x256xf32> to vector<32x256xf32>
    %18 = vector.shape_cast %15 : vector<32x256xf32> to vector<1x32x256xf32>
    tpu.vector_store %arg7[%c0_10, %c0_11, %c0_12], %18 {strides = array<i32>} : memref<1x32x256xf32, #tpu.memory_space<vmem>>, vector<1x32x256xf32>,
    return
  }
  func.func @transform_0(%arg0: i32, %arg1: i32) -> (i32, i32, i32) {
    %c0_i32 = arith.constant 0 : i32
    %c0_i32_0 = arith.constant 0 : i32
    return %arg0, %c0_i32, %arg1 : i32, i32, i32
  }
  func.func @transform_1(%arg0: i32, %arg1: i32) -> (i32, i32) {
    %c0_i32 = arith.constant 0 : i32
    %c0_i32_0 = arith.constant 0 : i32
    %c0_i32_1 = arith.constant 0 : i32
    return %c0_i32, %c0_i32_0 : i32, i32
  }
  func.func @transform_2(%arg0: i32, %arg1: i32) -> (i32, i32) {
    %c0_i32 = arith.constant 0 : i32
    %c0_i32_0 = arith.constant 0 : i32
    %c0_i32_1 = arith.constant 0 : i32
    return %c0_i32, %c0_i32_0 : i32, i32
  }
  func.func @transform_3(%arg0: i32, %arg1: i32) -> (i32, i32) {
    %c0_i32 = arith.constant 0 : i32
    %c0_i32_0 = arith.constant 0 : i32
    %c0_i32_1 = arith.constant 0 : i32
    return %c0_i32, %c0_i32_0 : i32, i32
  }
  func.func @transform_4(%arg0: i32, %arg1: i32) -> (i32, i32) {
    %c0_i32 = arith.constant 0 : i32
    %c0_i32_0 = arith.constant 0 : i32
    %c0_i32_1 = arith.constant 0 : i32
    return %c0_i32, %c0_i32_0 : i32, i32
  }
  func.func @transform_5(%arg0: i32, %arg1: i32) -> (i32, i32, i32) {
    %c0_i32 = arith.constant 0 : i32
    %c0_i32_0 = arith.constant 0 : i32
    return %arg0, %c0_i32, %arg1 : i32, i32, i32
  }
}

</mosaic_0001>

<bundles_post_ra>
// kernel: tpu_custom_call.1
= control target key start
LH: loop header
LB: loop body
LE: loop exit
PB: predicated region body
PF: predicated region fallthrough
CT: control target
= control target key end

     0   :  { %10 = vsyncpa [#allocation3], 0  ;;  %s921_s0 = inlined_call_operand.vmem [shape: f32[2,3,256], index: 0, kind: input, shape index: {}]   ;;  %s922_s1 = inlined_call_operand.vmem [shape: f32[32,9], index: 1, kind: input, shape index: {}]   ;;  %s923_s2 = inlined_call_operand.vmem [shape: f32[32,1], index: 2, kind: input, shape index: {}]   ;;  %s924_s3 = inlined_call_operand.vmem [shape: f32[1,256], index: 3, kind: input, shape index: {}]   ;;  %s925_s4 = inlined_call_operand.vmem [shape: f32[1,256], index: 4, kind: input, shape index: {}]   ;;  %s926_s5 = inlined_call_operand.hbm [shape: f32[2,32,256], index: 5, kind: output, shape index: {}]  }
   0x1   :  { %12 = vsyncpa [#allocation3 + $0x1], 0  ;;  %s768_s18 = smov 0   ;;  %s770_s19 = smov 0  }
   0x2   :  { %s772_s20 = smov 0   ;;  %s774_s21 = smov 0  }
   0x3   :  { %s776_s22 = smov 0   ;;  %s778_s23 = smov 0  }
   0x4 LB: > { %s556_s24 = sadd.s32 4294967295, %s728_s23   ;;  %s557_s25 = sadd.s32 4294967294, %s728_s23   ;;  %s728_s23 = sphi %s778_s23, %s18_s23   ;;  %s724_s22 = sphi %s776_s22, %s933_s22   ;;  %s720_s21 = sphi %s774_s21, %s932_s21   ;;  %s716_s20 = sphi %s772_s20, %s931_s20   ;;  %s712_s19 = sphi %s770_s19, %s930_s19   ;;  %s708_s18 = sphi %s768_s18, %s929_s18  }
   0x5   : > { %s30_s26 = sadd.s32 1, %s724_s22  ;;  %s151_s27 = sadd.s32 1, %s716_s20 }
   0x6   : > { %p32_p0 = scmp.ge.s32.totalorder %s30_s26, 2  ;;  %p161_p1 = scmp.ne.s32.totalorder %s716_s20, %s712_s19 }
   0x7   : > { %p162_p2 = scmp.eq.s32.totalorder %s556_s24, 1  ;;  %p167_p3 = scmp.ne.s32.totalorder %s712_s19, %s708_s18 }
   0x8   : > { %s935_s26 = smov (%p32_p0, %s30_s26), 0  ;;  %p168_p5 = scmp.eq.s32.totalorder %s557_s25, 1 }
   0x9   : > { %p808_p4 = por %p162_p2, %p161_p1  ;;  %s146_s29 = ssub.s32 %s724_s22, %s935_s26 }
   0xa   : > { %p560_p6 = scmp.ge.s32.totalorder %s728_s23, 1  ;;  %p149_p7 = scmp.eq.s32.totalorder %s146_s29, 0 }
   0xb   : > { %p815_p8 = por %p168_p5, %p167_p3  ;;  %p211_p9 = scmp.lt.s32.totalorder %s728_s23, 3 }
   0xc   : > { %s821_s6 = scalar_select %p149_p7, %s716_s20, %s151_s27  }
   0xd   : > { %p212_p10 = pnand %p560_p6, %p211_p9 }
   0xe   : > { %p244_p11 = scmp.lt.s32.totalorder (!%p212_p10), %s720_s21, 1  ;;  %s730_s12 = smov (!%p212_p10), 1   ;;  %v732_v2 = vmov (!%p212_p10), 0.0   ;;  %v323_v3 = vld [vmem:[%s923_s2 + $0x8] sm:$0xff] (!%p212_p10)  ;;  %v322_v4 = vld [vmem:[%s923_s2] sm:$0xff] (!%p212_p10)  ;;  %v733_v5 = vmov (!%p212_p10), 0   ;;  %v262_v8 = vlaneseq (!%p212_p10) }
   0xf   : > { %215 = sbr.rel (%p212_p10) target bundleno = 392 (0x188), region = 40  ;;  %s731_s13 = smov (!%p212_p10), 127   ;;  %428 = vmatprep.mubr.f32.mxu0 (!%p212_p10), %v732_v2  ;;  %440 = vmatprep.mubr.f32.mxu1 (!%p212_p10), %v732_v2  ;;  %v324_v6 = vld [vmem:[%s923_s2 + $0x10] sm:$0xff] (!%p212_p10)  ;;  %v325_v7 = vld [vmem:[%s923_s2 + $0x18] sm:$0xff] (!%p212_p10)  ;;  %v267_v13 = vld [vmem:[%s924_s3] sm:$0x3] (!%p212_p10) }
  0x10   : > { %648 = vset.pattern.permute.xlu1 (!%p212_p10), %v733_v5  ;;  %647 = vset.pattern.permute.xlu0 (!%p212_p10), %v733_v5  ;;  %v270_v9 = vshrl.u32 (!%p212_p10), %v262_v8, 7  ;;  %v263_v10 = vand.u32 (!%p212_p10), 127, %v262_v8  ;;  %v288_v14 = vld [vmem:[%s925_s4] sm:$0x3] (!%p212_p10)  ;;  %vm312_vm2 = vcmask (!%p212_p10), 1042432   ;;  %vm315_vm3 = vcmask (!%p212_p10), 1045504  }
  0x11   : > { %vm359_vm4 = vcmask (!%p212_p10), 1040384   ;;  %vm734_vm5 = vmmov (!%p212_p10), 1   ;;  %v318_v41 = vld [vmem:[%s922_s1] sm:$0xff] (!%p212_p10)  ;;  %vm346_vm7 = vcmask (!%p212_p10), 72704   ;;  %v320_v42 = vld [vmem:[%s922_s1 + $0x10] sm:$0xff] (!%p212_p10)  ;;  %v319_v43 = vld [vmem:[%s922_s1 + $0x8] sm:$0xff] (!%p212_p10) }
  0x12   : > { %v271_v11 = vsub.s32 (!%p212_p10), 0, %v270_v9  ;;  %v275_v12 = vsub.s32 (!%p212_p10), 1, %v270_v9  ;;  %vm264_vm0 = vcmp.lt.s32.totalorder (!%p212_p10), %v263_v10, 1  ;;  %vm285_vm1 = vcmp.lt.s32.totalorder (!%p212_p10), %v263_v10, 127  ;;  %vm578_vm6 = vmpackc.low (!%p212_p10), %vm359_vm4, %vm734_vm5  ;;  %v321_v44 = vld [vmem:[%s922_s1 + $0x18] sm:$0xff] (!%p212_p10)  ;;  %s240_s25 = sand.u32 (!%p212_p10), 1, %s712_s19  }
  0x13   : > { %s561_s27 = sshll.u32 (!%p212_p10), %s240_s25, 6  ;;  %s576_s29 = sshll.u32 (!%p212_p10), %s720_s21, 10 }
  0x14   : > { %v272_v17 = vrot.slane (!%p212_p10), %v267_v13, %v271_v11  ;;  %v276_v18 = vrot.slane (!%p212_p10), %v267_v13, %v275_v12  ;;  %v293_v19 = vrot.slane (!%p212_p10), %v288_v14, %v271_v11  ;;  %v297_v20 = vrot.slane (!%p212_p10), %v288_v14, %v275_v12 }
  0x16   : > { %s245_s7 = scalar_select %p244_p11, %s720_s21, 1 }
  0x17   : > { %s875_s21 = scalar_lea.sflag [#allocation3], %s240_s25 }
  0x18   : > { %s575_s8 = sshll.u32 %s245_s7, 3  ;;  %s242_s7 = scalar_lea.vmem [#allocation2], %s561_s27 }
  0x19   : > { %s251_s11 = scalar_lea.vmem %s921_s0, %s575_s8  ;;  %s477_s8 = sshll.u32 %s242_s7, 4  ;;  %s871_s8 = int_to_ptr.vmem [resolvable:$true] %s477_s8 }
  0x1a   : > { %v254_v0 = vld [vmem:[%s251_s11] sm:$0x77]  ;;  %s869_s11 = scalar_lea.hbm %s926_s5, %s576_s29 }
  0x1b   : > { %258 = vrot.lane.b32.xlu1 %v254_v0, %s730_s12  ;;  %281 = vrot.lane.b32.xlu0 %v254_v0, %s731_s13  ;;  %v256_v1 = vcombine.high %v254_v0, %v254_v0  ;;  %v302_v21 = vrot.slane %v254_v0, 5 }
  0x1d   : > { %v303_v22 = vrot.slane %v256_v1, 5 }
  0x1f   : > { %260 = vrot.lane.b32.xlu1 %v256_v1, %s730_s12  ;;  %283 = vrot.lane.b32.xlu0 %v256_v1, %s731_s13  ;;  %s650_s12 = scalar_lea.vmem %s871_s8, 1024  ;;  %s735_s13 = smov [#allocation2]  }
  0x20   : > { %p651_p12 = scmp.ne.s32.totalorder %s871_s8, %s650_s12  ;;  %s654_s14 = sshll.u32 %s735_s13, 4  ;;  %s655_s14 = int_to_ptr.vmem [resolvable:$false] %s654_s14 }
  0x21   : > { %s656_s15 = scalar_lea.vmem %s655_s14, 2048  ;;  %p657_p1 = scmp.lt.s32.totalorder %s871_s8, %s655_s14 }
  0x22   : > { %p652_p13 = pnand %p651_p12, %p808_p4  ;;  %p658_p2 = scmp.lt.s32.totalorder %s656_s15, %s650_s12 }
  0x23   : > { %333 = vperm.xlu1 %648, %v323_v3   ;;  %328 = vperm.xlu0 %647, %v322_v4  }
  0x24   : > { %p653_p0 = pneg %p652_p13  ;;  %p659_p3 = por %p658_p2, %p657_p1 }
  0x26   : > { %p660_p5 = pnand %p659_p3, %p653_p0 }
  0x27   : > { %338 = vperm.xlu1 %648, %v324_v6   ;;  %343 = vperm.xlu0 %647, %v325_v7  }
  0x8d   : > { %v259_v15 = vpop.permute.xlu1 %258  ;;  %v282_v16 = vpop.permute.xlu0 %281 }
  0x91   : > { %v261_v23 = vpop.permute.xlu1 %260  ;;  %v284_v24 = vpop.permute.xlu0 %283 }
  0x92   : > { %v265_v25 = vsel %vm264_vm0, %v259_v15, %v261_v23  ;;  %v266_v26 = vsel %vm264_vm0, %v261_v23, %v259_v15  ;;  %v286_v27 = vsel %vm285_vm1, %v282_v16, %v284_v24  ;;  %v287_v28 = vsel %vm285_vm1, %v284_v24, %v282_v16 }
  0x93   : > { %v279_v29 = vmul.f32 %v272_v17, %v266_v26  ;;  %v280_v30 = vmul.f32 %v276_v18, %v265_v25  ;;  %v300_v31 = vmul.f32 %v293_v19, %v286_v27  ;;  %v301_v32 = vmul.f32 %v297_v20, %v287_v28 }
  0x95   : > { %v308_v33 = vrot.slane %v300_v31, 2  ;;  %v309_v34 = vrot.slane %v301_v32, 2  ;;  %v314_v35 = vsel %vm312_vm2, %v280_v30, %v303_v22  ;;  %v313_v36 = vsel %vm312_vm2, %v279_v29, %v302_v21 }
  0x97   : > { %v317_v37 = vsel %vm315_vm3, %v314_v35, %v309_v34  ;;  %v316_v38 = vsel %vm315_vm3, %v313_v36, %v308_v33 }
  0x98   : > { %v577_v39 = vpack.c.bf16 %v309_v34, %v317_v37  ;;  %v580_v40 = vpack.c.bf16 %v308_v33, %v316_v38 }
  0x9a   : > { %579 = vmatprep.subr.msk.bf16.mxu0 %vm578_vm6, %v577_v39  ;;  %583 = vmatprep.subr.msk.bf16.mxu1 %vm578_vm6, %v577_v39 }
  0x9b   : > { %582 = vmatpush1.bf16.msk.msra.mxu0 %vm578_vm6, %v580_v40  ;;  %584 = vmatpush1.bf16.msk.msra.mxu1 %vm578_vm6, %v580_v40 }
  0x9e   : > { %566 = vmatmul.mubr.msk.f32.vlgmr.msra.gmra.mrb[0].mxu0 %vm346_vm7, %v318_v41  ;;  %568 = vmatmul.mubr.msk.f32.vlgmr.msra.gmra.mrb[0].mxu1 %vm346_vm7, %v320_v42 }
  0x9f   : > { %434 = vmatprep.mubr.f32.mxu0 %v732_v2  ;;  %446 = vmatprep.mubr.f32.mxu1 %v732_v2 }
  0xa2   : > { %567 = vmatmul.mubr.msk.f32.gmra.mrb[2].mxu0 %vm346_vm7, %v319_v43  ;;  %569 = vmatmul.mubr.msk.f32.gmra.mrb[2].mxu1 %vm346_vm7, %v321_v44  ;;  %v334_v45 = vpop.permute.xlu1 %333  ;;  %v329_v46 = vpop.permute.xlu0 %328 }
  0xa6   : > { %v339_v47 = vpop.permute.xlu1 %338  ;;  %v344_v56 = vpop.permute.xlu0 %343 }
 0x171   : > { %v430_v48 = vpop.f32.mrb[0].mxu0  ;;  %v442_v49 = vpop.f32.mrb[0].mxu1 }
 0x172   : > { %v431_v50 = vadd.f32 %v430_v48, %v329_v46  ;;  %v443_v51 = vadd.f32 %v442_v49, %v339_v47  ;;  %v432_v52 = vpop.f32.mrb[1].mxu0  ;;  %v444_v53 = vpop.f32.mrb[1].mxu1 }
 0x173   : > { %v433_v54 = vadd.f32 %v432_v52, %v329_v46  ;;  %v445_v55 = vadd.f32 %v444_v53, %v339_v47 }
 0x174   : > { %453 = vst [vmem:[%s242_s7] sm:$0xff] %v431_v50  ;;  %457 = vst [vmem:[%s242_s7 + $0x20] sm:$0xff] %v443_v51 }
 0x175   : > { %454 = vst [vmem:[%s242_s7 + $0x8] sm:$0xff] %v433_v54  ;;  %458 = vst [vmem:[%s242_s7 + $0x28] sm:$0xff] %v445_v55  ;;  %v436_v57 = vpop.f32.mrb[2].mxu0  ;;  %v448_v58 = vpop.f32.mrb[2].mxu1 }
 0x176   : > { %v437_v59 = vadd.f32 %v436_v57, %v334_v45  ;;  %v449_v60 = vadd.f32 %v448_v58, %v344_v56  ;;  %v438_v61 = vpop.f32.mrb[3].mxu0  ;;  %v450_v62 = vpop.f32.mrb[3].mxu1 }
 0x177   : > { %v439_v63 = vadd.f32 %v438_v61, %v334_v45  ;;  %v451_v0 = vadd.f32 %v450_v62, %v344_v56 }
 0x178   : > { %455 = vst [vmem:[%s242_s7 + $0x10] sm:$0xff] %v437_v59  ;;  %459 = vst [vmem:[%s242_s7 + $0x30] sm:$0xff] %v449_v60 }
 0x179   : > { %456 = vst [vmem:[%s242_s7 + $0x18] sm:$0xff] %v439_v63  ;;  %460 = vst [vmem:[%s242_s7 + $0x38] sm:$0xff] %v451_v0 }
 0x17a   : > { %663 = shalt.err (!%p660_p5)
}
 0x17b   : > { %s664_s16 = scalar_lea.hbm %s869_s11, 1024  ;;  %s668_s25 = scalar_lea.hbm %s926_s5, 2048 }
 0x17c   : > { %p665_p6 = scmp.ne.s32.totalorder %s869_s11, %s664_s16  ;;  %p669_p10 = scmp.lt.u32.totalorder %s869_s11, %s926_s5 }
 0x17d   : > { %p670_p11 = scmp.lt.u32.totalorder %s668_s25, %s664_s16  ;;  %p672_p13 = scmp.lt.u32.totalorder %s664_s16, %s869_s11 }
 0x17e   : > { %p666_p7 = pnand %p665_p6, %p808_p4 }
 0x17f   : > { %p671_p12 = por %p670_p11, %p669_p10 }
 0x180   : > { %p667_p9 = pneg %p666_p7 }
 0x181   : > { %p673_p0 = por %p672_p13, %p671_p12 }
 0x183   : > { %p674_p1 = pnand %p673_p0, %p667_p9 }
 0x185   : > { %677 = shalt.err (!%p674_p1)
}
 0x186   : > { %s736_s7 = smov 256   ;;  %s737_s9 = smov 16  }
 0x187   : > { %585 = dma.vmem_to_hbm [thread:$0]  (%p808_p4), %s871_s8, 1024, %s869_s11, %s875_s21, %s736_s7, %s736_s7, %s737_s9  }
 0x188 PF: > { %p591_p2 = scmp.ge.s32.totalorder %s728_s23, 2  ;;  %s492_s10 = sand.u32 1, %s708_s18  }
 0x189   : > { %s493_s12 = scalar_lea.sflag [#allocation3], %s492_s10 }
 0x18a   : > { %p588_p3 = pnand %p591_p2, %p815_p8 }
 0x18c   : > { %703 = dma.done.wait (!%p588_p3), %s493_s12, 1024  }
 0x18d   : > { %705 = vsyncadd (!%p588_p3), %s493_s12, 4294966272  ;;  %s18_s23 = sadd.s32 1, %s728_s23   ;;  %s929_s18 = smov %s712_s19 }
 0x18e   : > { %p15_p5 = scmp.ge.s32.totalorder %s18_s23, 4   ;;  %s930_s19 = smov %s716_s20 }
 0x18f   : > { %s931_s20 = smov %s821_s6  ;;  %s932_s21 = smov %s724_s22 }
 0x190   : > { %s933_s22 = smov %s935_s26  ;;  %17 = sbr.rel (!%p15_p5) target bundleno = 4 (0x4), region = 75 }
 0x197   :  { %498 = vsyncpa [#allocation3], 1 }
 0x198   :  { %500 = vsyncpa [#allocation3 + $0x1], 1 }

</bundles_post_ra>
